<compile_context>
chip_gen: v5e
topology: v5e:2x2
jax: 0.10.0
libtpu: 0.0.40
codegen_flags: <defaults>
</compile_context>

<pallas_src>
import numpy as np

import jax
import jax.numpy as jnp
from jax import lax
from jax.experimental import pallas as pl
from jax.experimental.pallas import tpu as pltpu


def _round_up(x, m):
    return (x + m - 1) // m * m


def _make_kernel(input_size, dropout_p, training):
    """Build a kernel specialized on (input_size, p, training)."""
    apply_dropout = bool(training) and dropout_p > 0.0
    keep_scale = np.float32(1.0 / (1.0 - dropout_p)) if dropout_p < 1.0 else np.float32(0.0)
    # Drop iff bits < p * 2^32  =>  keep probability is exactly (1 - p).
    threshold = np.uint32(min(int(round(dropout_p * (2.0 ** 32))), 2 ** 32 - 1))

    def kernel(bits_ref, xh_ref, w_ref, b_ref, out_ref):
        # xh_ref is the concatenated [x_t | h_prev] operand, shape (B, I+H).
        z = xh_ref[...]
        if apply_dropout:
            # Dropout applies only to the x columns (col < input_size).
            col = lax.broadcasted_iota(jnp.int32, z.shape, 1)
            keep = bits_ref[...] >= threshold
            factor = jnp.where(
                col < input_size,
                jnp.where(keep, keep_scale, np.float32(0.0)),
                np.float32(1.0),
            ).astype(z.dtype)
            z = z * factor
        # Single fused GEMM: [x_drop | h] @ [[Wx^T],[Wh^T]]  (contraction on axis 0,
        # no transpose inside the kernel), then one bias add + tanh.
        acc = jnp.dot(z, w_ref[...], preferred_element_type=jnp.float32)
        out_ref[...] = jnp.tanh(acc + b_ref[...])

    return kernel


def rnn_cell_with_dropout(x_t, h_prev, w_x, b_x, w_h, b_h, key,
                          dropout_p=0.5, training=True):
    """x_t: [B, I], h_prev: [B, H], w_x: [H, I], w_h: [H, H] (PyTorch layout).

    `key` must be a fresh jax.random key per forward call (fresh dropout mask).
    """
    B, I = x_t.shape
    H = w_x.shape[0]
    H_pad = _round_up(H, 128)

    # Host-side layout plumbing (done per call here; in a real model these
    # weight transforms would be done once at parameter-load time).
    w = jnp.concatenate([w_x.T, w_h.T], axis=0)               # (I+H, H)
    b = (b_x + b_h).reshape(1, H)                             # single summed bias
    if H_pad != H:
        w = jnp.pad(w, ((0, 0), (0, H_pad - H)))
        b = jnp.pad(b, ((0, 0), (0, H_pad - H)))
    xh = jnp.concatenate([x_t, h_prev], axis=1)               # (B, I+H)
    bits = jax.random.bits(key, (B, I + H), dtype=jnp.uint32)

    kernel = _make_kernel(I, float(dropout_p), bool(training))
    vmem = pl.BlockSpec(memory_space=pltpu.MemorySpace.VMEM)

    out = pl.pallas_call(
        kernel,
        out_shape=jax.ShapeDtypeStruct((B, H_pad), jnp.float32),
        in_specs=[vmem, vmem, vmem, vmem],
        out_specs=vmem,
    )(bits, xh, w, b)

    return out[:, :H] if H_pad != H else out


# TODO(synk): if this cell is driven over T timesteps, hoist the time loop into
# one pallas_call (grid=(T,), weights resident via index_map -> block 0, h in a
# VMEM scratch accumulator) instead of T separate launches.


if __name__ == "__main__":
    # Small shapes consistent with the module's forward.
    B = 8
    INPUT_SIZE = 32
    HIDDEN_SIZE = 64
    P = 0.5

    key = jax.random.PRNGKey(0)
    kx, kh, kwx, kbx, kwh, kbh, kdrop = jax.random.split(key, 7)

    x_t = jax.random.normal(kx, (B, INPUT_SIZE), dtype=jnp.float32)
    h_prev = jax.random.normal(kh, (B, HIDDEN_SIZE), dtype=jnp.float32)

    # Deterministic parameter init (nn.Linear-like uniform bounds).
    bound_x = 1.0 / (INPUT_SIZE ** 0.5)
    bound_h = 1.0 / (HIDDEN_SIZE ** 0.5)
    w_x = jax.random.uniform(kwx, (HIDDEN_SIZE, INPUT_SIZE),
                             minval=-bound_x, maxval=bound_x, dtype=jnp.float32)
    b_x = jax.random.uniform(kbx, (HIDDEN_SIZE,),
                             minval=-bound_x, maxval=bound_x, dtype=jnp.float32)
    w_h = jax.random.uniform(kwh, (HIDDEN_SIZE, HIDDEN_SIZE),
                             minval=-bound_h, maxval=bound_h, dtype=jnp.float32)
    b_h = jax.random.uniform(kbh, (HIDDEN_SIZE,),
                             minval=-bound_h, maxval=bound_h, dtype=jnp.float32)

    h_t = rnn_cell_with_dropout(x_t, h_prev, w_x, b_x, w_h, b_h, key=kdrop,
                                dropout_p=P, training=True)
    h_t = jax.block_until_ready(h_t)

    # Pure-JAX reference using the exact same dropout bits.
    bits_ref = jax.random.bits(kdrop, (B, INPUT_SIZE + HIDDEN_SIZE),
                               dtype=jnp.uint32)
    keep_ref = bits_ref[:, :INPUT_SIZE] >= np.uint32(int(round(P * 2 ** 32)))
    x_dropped = jnp.where(keep_ref, x_t * (1.0 / (1.0 - P)), 0.0)
    ref = jnp.tanh(x_dropped @ w_x.T + b_x + h_prev @ w_h.T + b_h)

    assert h_t.shape == (B, HIDDEN_SIZE)
    assert bool(jnp.all(jnp.isfinite(h_t)))
    assert bool(jnp.all(jnp.abs(h_t) <= 1.0))                 # tanh range
    assert bool(jnp.allclose(h_t, ref, rtol=1e-5, atol=1e-5))
    print("KERNEL_OK")
</pallas_src>

<mosaic_0001>
module attributes {stable_mosaic.version = 11 : i64} {
  func.func @kernel(%arg0: memref<8x96xi32, #tpu.memory_space<vmem>>, %arg1: memref<8x96xf32, #tpu.memory_space<vmem>>, %arg2: memref<96x128xf32, #tpu.memory_space<vmem>>, %arg3: memref<1x128xf32, #tpu.memory_space<vmem>>, %arg4: memref<8x128xf32, #tpu.memory_space<vmem>>) attributes {dimension_semantics = [], scalar_prefetch = 0 : i64, scratch_operands = 0 : i64, tpu.core_type = #tpu.core_type<tc>} {
    %c0 = arith.constant 0 : index
    %c0_0 = arith.constant 0 : index
    %0 = vector.load %arg1[%c0, %c0_0] : memref<8x96xf32, #tpu.memory_space<vmem>>, vector<8x96xf32>
    %1 = tpu.iota {dimensions = array<i32: 1>} : vector<8x96xi32>
    %c0_1 = arith.constant 0 : index
    %c0_2 = arith.constant 0 : index
    %2 = vector.load %arg0[%c0_1, %c0_2] : memref<8x96xi32, #tpu.memory_space<vmem>>, vector<8x96xi32>
    %c-2147483648_i32 = arith.constant -2147483648 : i32
    %3 = vector.broadcast %c-2147483648_i32 : i32 to vector<8x96xi32>
    %4 = arith.cmpi uge, %2, %3 : vector<8x96xi32>
    %c32_i32 = arith.constant 32 : i32
    %5 = vector.broadcast %c32_i32 : i32 to vector<8x96xi32>
    %6 = arith.cmpi slt, %1, %5 : vector<8x96xi32>
    %cst = arith.constant 2.000000e+00 : f32
    %cst_3 = arith.constant 0.000000e+00 : f32
    %7 = vector.broadcast %cst : f32 to vector<8x96xf32>
    %8 = vector.broadcast %cst_3 : f32 to vector<8x96xf32>
    %9 = arith.select %4, %7, %8 : vector<8x96xi1>, vector<8x96xf32>
    %cst_4 = arith.constant 1.000000e+00 : f32
    %10 = vector.broadcast %cst_4 : f32 to vector<8x96xf32>
    %11 = arith.select %6, %9, %10 : vector<8x96xi1>, vector<8x96xf32>
    %12 = arith.mulf %0, %11 : vector<8x96xf32>
    %c0_5 = arith.constant 0 : index
    %c0_6 = arith.constant 0 : index
    %13 = vector.load %arg2[%c0_5, %c0_6] : memref<96x128xf32, #tpu.memory_space<vmem>>, vector<96x128xf32>
    %cst_7 = arith.constant dense<0.000000e+00> : vector<8x128xf32>
    %14 = tpu.matmul %12, %13, %cst_7 {dimension_numbers = #tpu.dot_dimension_numbers<[1], [0], [0], [1], [0, 0, 1, 1], [], []>} : vector<8x96xf32>, vector<96x128xf32>, vector<8x128xf32> -> vector<8x128xf32>
    %c0_8 = arith.constant 0 : index
    %c0_9 = arith.constant 0 : index
    %15 = vector.load %arg3[%c0_8, %c0_9] : memref<1x128xf32, #tpu.memory_space<vmem>>, vector<1x128xf32>
    %16 = vector.broadcast %15 : vector<1x128xf32> to vector<8x128xf32>
    %17 = arith.addf %14, %16 : vector<8x128xf32>
    %18 = math.tanh %17 : vector<8x128xf32>
    %c0_10 = arith.constant 0 : index
    %c0_11 = arith.constant 0 : index
    %19 = vector.load %arg4[%c0_10, %c0_11] : memref<8x128xf32, #tpu.memory_space<vmem>>, vector<8x128xf32>
    tpu.vector_store %arg4[%c0_10, %c0_11], %18 {strides = array<i32>} : memref<8x128xf32, #tpu.memory_space<vmem>>, vector<8x128xf32>,
    return
  }
}

</mosaic_0001>

<bundles_post_ra>
// kernel: tpu_custom_call.1
= control target key start
LH: loop header
LB: loop body
LE: loop exit
PB: predicated region body
PF: predicated region fallthrough
CT: control target
= control target key end

     0   :  { %9 = vsyncpa [#allocation3], 0  ;;  %s293_s0 = inlined_call_operand.hbm [shape: u32[8,96], index: 0, kind: input, shape index: {}]   ;;  %s294_s1 = inlined_call_operand.hbm [shape: f32[8,96], index: 1, kind: input, shape index: {}]   ;;  %s295_s2 = inlined_call_operand.hbm [shape: f32[96,128], index: 2, kind: input, shape index: {}]   ;;  %s296_s3 = inlined_call_operand.vmem [shape: f32[1,128], index: 3, kind: input, shape index: {}]   ;;  %s297_s4 = inlined_call_operand.hbm [shape: f32[8,128], index: 4, kind: output, shape index: {}]  }
   0x1   :  { %10 = vsyncpa [#allocation6], 0  ;;  %s28_s17 = sshll.u32 %s294_s1, 4  ;;  %s29_s17 = int_to_ptr.hbm [resolvable:$true] %s28_s17 }
   0x2   :  { %11 = vsyncpa [#allocation4], 0  ;;  %s246_s18 = smov [#allocation5]   ;;  %s17_s22 = sshll.u32 %s293_s0, 4  ;;  %s18_s22 = int_to_ptr.hbm [resolvable:$true] %s17_s22 }
   0x3   :  { %s30_s19 = sshll.u32 %s246_s18, 4  ;;  %s247_s23 = smov [#allocation2]   ;;  %s31_s19 = int_to_ptr.vmem [resolvable:$true] %s30_s19 }
   0x4   :  { %33 = dma.hbm_to_vmem [thread:$0]  %s29_s17, 128, %s31_s19, [#allocation6]  }
   0x5   :  { %s19_s24 = sshll.u32 %s247_s23, 4  ;;  %s38_s27 = sshll.u32 %s295_s2, 4  ;;  %s20_s24 = int_to_ptr.vmem [resolvable:$true] %s19_s24  ;;  %s39_s27 = int_to_ptr.hbm [resolvable:$true] %s38_s27 }
   0x6   :  { %22 = dma.hbm_to_vmem [thread:$0]  %s18_s22, 128, %s20_s24, [#allocation3]  }
   0x7   :  { %s248_s1 = smov [#allocation7]   ;;  %s249_s29 = smov 128  }
   0x8   :  { %s40_s28 = sshll.u32 %s248_s1, 4  ;;  %s250_s30 = smov 8   ;;  %s41_s28 = int_to_ptr.vmem [resolvable:$true] %s40_s28 }
   0x9   :  { %46 = dma.hbm_to_vmem [thread:$0]  %s39_s27, 1536, %s41_s28, [#allocation6], %s249_s29, %s249_s29, %s250_s30  }
   0xa   :  { %240 = dma.done.wait [#allocation3], 128  }
   0xb   :  { %241 = vsyncadd [#allocation3], 4294967168 }
   0xc   :  { %242 = dma.done.wait [#allocation6], 1664  }
   0xd   :  { %243 = vsyncadd [#allocation6], 4294965632  ;;  %v83_v0 = vld [vmem:[#allocation7 + $0x58] sm:$0xff]  ;;  %v82_v1 = vld [vmem:[#allocation7 + $0x50] sm:$0xff]  ;;  %v62_v6 = vlaneseq  ;;  %v251_v13 = vmov 0.0   ;;  %vm88_vm2 = vcmask 785408  }
   0xe   :  { %96 = vmatpush.msra.mxu0 %v83_v0  ;;  %v81_v2 = vld [vmem:[#allocation7 + $0x48] sm:$0xff]  ;;  %v80_v3 = vld [vmem:[#allocation7 + $0x40] sm:$0xff]  ;;  %v64_v4 = vld [vmem:[#allocation2] sm:$0xff]  ;;  %s252_s5 = smov [#allocation8]   ;;  %s121_s9 = sshll.u32 %s297_s4, 4  ;;  %s122_s9 = int_to_ptr.hbm [resolvable:$true] %s121_s9 }
   0xf   :  { %v79_v5 = vld [vmem:[#allocation7 + $0x38] sm:$0xff]  ;;  %v132_v7 = vxor.u32 2147483648, %v64_v4  ;;  %v78_v8 = vld [vmem:[#allocation7 + $0x30] sm:$0xff]  ;;  %v77_v9 = vld [vmem:[#allocation7 + $0x28] sm:$0xff]  ;;  %v63_v10 = vand.u32 127, %v62_v6  ;;  %s119_s6 = sshll.u32 %s252_s5, 4  ;;  %s120_s6 = int_to_ptr.vmem [resolvable:$true] %s119_s6 }
  0x10   :  { %97 = vmatpush.msra.mxu0 %v82_v1  ;;  %v76_v11 = vld [vmem:[#allocation7 + $0x20] sm:$0xff]  ;;  %v75_v12 = vld [vmem:[#allocation7 + $0x18] sm:$0xff]  ;;  %v74_v15 = vld [vmem:[#allocation7 + $0x10] sm:$0xff] }
  0x11   :  { %vm67_vm0 = vcmp.ge.s32.totalorder %v132_v7, 0  ;;  %vm68_vm1 = vcmp.lt.s32.totalorder %v63_v10, 32  ;;  %v61_v16 = vld [vmem:[#allocation5] sm:$0xff]  ;;  %v73_v18 = vld [vmem:[#allocation7 + $0x8] sm:$0xff]  ;;  %v72_v19 = vld [vmem:[#allocation7] sm:$0xff] }
  0x12   :  { %98 = vmatpush.msra.mxu0 %v81_v2  ;;  %v69_v14 = vsel %vm67_vm0, 2.0, %v251_v13  ;;  %v141_v21 = vld [vmem:[%s296_s3] ss:$0 sm:$0xff] }
  0x13   :  { %v70_v17 = vsel %vm68_vm1, %v69_v14, 1.0 }
  0x14   :  { %99 = vmatpush.msra.mxu0 %v80_v3  ;;  %v71_v20 = vmul.f32 %v70_v17, %v61_v16 }
  0x16   :  { %100 = vmatpush.msra.mxu0 %v79_v5 }
  0x18   :  { %101 = vmatpush.msra.mxu0 %v78_v8 }
  0x1a   :  { %102 = vmatpush.msra.mxu0 %v77_v9 }
  0x1c   :  { %103 = vmatpush.msra.mxu0 %v76_v11 }
  0x1e   :  { %104 = vmatpush.msra.mxu0 %v75_v12 }
  0x20   :  { %105 = vmatpush.msra.mxu0 %v74_v15 }
  0x22   :  { %106 = vmatpush.msra.mxu0 %v73_v18 }
  0x24   :  { %107 = vmatpush.msra.mxu0 %v72_v19 }
  0x25   :  { %133 = vmatmul.msk.f32.vlgmr.msra.gmra.mxu0 %vm88_vm2, %v71_v20 }
  0xa2   :  { %v109_v22 = vpop.f32.mrf.mxu0 }
  0xa3   :  { %v110_v23 = vadd.f32 %v141_v21, %v109_v22 }
  0xa5   :  { %142 = vtanh.f32 %v110_v23 }
  0xab   :  { %v143_v24 = vpop.eup %142 }
  0xac   :  { %113 = vst [vmem:[#allocation8] sm:$0xff] %v143_v24 }
  0xad   :  { %124 = dma.vmem_to_hbm [thread:$0]  %s120_s6, 128, %s122_s9, [#allocation4]  }
  0xae   :  { %244 = dma.done.wait [#allocation4], 128  }
  0xaf   :  { %245 = vsyncadd [#allocation4], 4294967168 }
  0xb0   :  { %129 = vsyncpa [#allocation3], 1 }
  0xb1   :  { %130 = vsyncpa [#allocation6], 1 }
  0xb2   :  { %131 = vsyncpa [#allocation4], 1 }

</bundles_post_ra>
